<compile_context>
chip_gen: v7x
topology: tpu7x:2x2x1
jax: 0.10.0
libtpu: 0.0.40
codegen_flags: <defaults>
</compile_context>

<pallas_src>
import jax
import jax.numpy as jnp
from jax.experimental import pallas as pl
from jax.experimental.pallas import tpu as pltpu


def _round_up(x, m):
    return ((x + m - 1) // m) * m


def _fused_heads_kernel(feat_ref, w_ref, b_ref, logits_ref, value_ref):
    """One MXU matmul computes actor logits + critic value for this batch tile.

    feat_ref:   [block_b, F]
    w_ref:      [F, A+1]   actor weights in cols [0:A], critic weight in col A
    b_ref:      [1, A+1]   float32 fused bias
    logits_ref: [block_b, A]
    value_ref:  [block_b, 1]
    """
    w = w_ref[...]
    feat = feat_ref[...].astype(w.dtype)            # bf16 MXU inputs when enabled
    acc = jnp.dot(feat, w, preferred_element_type=jnp.float32)
    out = acc + b_ref[...]                          # bias add stays f32 (v5e-safe)
    a = logits_ref.shape[-1]
    logits_ref[...] = out[:, :a].astype(logits_ref.dtype)
    value_ref[...] = out[:, a:a + 1].astype(value_ref.dtype)


def _select_block_b(batch, target):
    # Single tile for small batches (block == full array dim is always legal).
    # Otherwise guarantee >= 2 tiles so dimension_semantics=("parallel",) can
    # shard the batch across both TensorCores on v7x, capped at `target` rows.
    if batch <= 256:
        return batch
    return min(_round_up(target, 8), _round_up(pl.cdiv(batch, 2), 8))


def policy_heads(features, w_fused, b_fused, dim_actions, *,
                 block_b=512, min_pallas_batch=128, force_pallas=False):
    """Returns (logits [B, A], value [B, 1]) from one fused actor+critic matmul."""
    B, F = features.shape
    NH = w_fused.shape[1]          # A + 1
    A = dim_actions

    if B < min_pallas_batch and not force_pallas:
        # Tiny batch: pallas_call fixed overhead dwarfs ~2*B*F*NH FLOPs; let XLA
        # fuse the dot (ideally into the net's final linear layer upstream).
        out = jnp.dot(features.astype(w_fused.dtype), w_fused,
                      preferred_element_type=jnp.float32) + b_fused
        return out[:, :A], out[:, A:A + 1]

    bb = _select_block_b(B, block_b)
    grid = (pl.cdiv(B, bb),)       # ragged last block handled by Pallas masking

    cost = pl.CostEstimate(
        flops=int(2 * B * F * NH),
        transcendentals=0,
        bytes_accessed=int(B * F * features.dtype.itemsize
                           + F * NH * w_fused.dtype.itemsize
                           + NH * 4
                           + B * (A + 1) * 4),
    )

    logits, value = pl.pallas_call(
        _fused_heads_kernel,
        out_shape=(jax.ShapeDtypeStruct((B, A), jnp.float32),
                   jax.ShapeDtypeStruct((B, 1), jnp.float32)),
        grid=grid,
        in_specs=[
            pl.BlockSpec((bb, F), lambda i: (i, 0)),
            pl.BlockSpec((F, NH), lambda i: (0, 0)),
            pl.BlockSpec((1, NH), lambda i: (0, 0)),
        ],
        out_specs=(
            pl.BlockSpec((bb, A), lambda i: (i, 0)),
            pl.BlockSpec((bb, 1), lambda i: (i, 0)),
        ),
        compiler_params=pltpu.CompilerParams(
            dimension_semantics=("parallel",),
            vmem_limit_bytes=8 * 1024 * 1024,
        ),
        cost_estimate=cost,
    )(features, w_fused, b_fused)
    return logits, value


class Policy:
    """JAX/Pallas port of the PyTorch Policy head stack (actor + critic heads)."""

    def __init__(self, output_size, dim_actions, key, param_dtype=jnp.float32):
        k_a, k_c = jax.random.split(key)
        ortho = jax.nn.initializers.orthogonal()
        # PyTorch nn.Linear layout: weight [out, in], bias [out].
        # CategoricalNet linear: orthogonal init with small gain, bias = 0.
        self.wa = ortho(k_a, (dim_actions, output_size), jnp.float32) * 0.01
        self.ba = jnp.zeros((dim_actions,), jnp.float32)
        # CriticHead linear: orthogonal init, bias = 0.
        self.wc = ortho(k_c, (1, output_size), jnp.float32)
        self.bc = jnp.zeros((1,), jnp.float32)
        self.dim_actions = dim_actions

        # Fused head parameters (hoisted out of the per-call path):
        # column block [0:A] = actor, column A = critic. No 128-lane padding —
        # the kernel emits the two heads as separate, exactly-sized outputs.
        w_fused = jnp.concatenate([self.wa.T, self.wc.T], axis=1)       # [F, A+1]
        self.w_fused = w_fused.astype(param_dtype)      # optional bf16 MXU inputs
        self.b_fused = jnp.concatenate([self.ba, self.bc])[None, :].astype(jnp.float32)

    def net(self, features, rnn_hidden_states, *unused):
        # TODO(synk): `self.net` is abstract/injected in the PyTorch Policy; a
        # pass-through net is used so the kernel covers the Policy-owned compute.
        return features, rnn_hidden_states

    def heads(self, features, **kw):
        # ONE pallas_call produces BOTH heads (actor logits + critic value).
        return policy_heads(features, self.w_fused, self.b_fused,
                            self.dim_actions, **kw)

    def forward(self, features, rnn_hidden_states, **kw):
        feats, rnn_hidden_states = self.net(features, rnn_hidden_states)
        logits, _value = self.heads(feats, **kw)
        return logits, rnn_hidden_states

    def evaluate(self, features, rnn_hidden_states, **kw):
        """(value, logits, rnn_hidden_states) from a single kernel launch."""
        feats, rnn_hidden_states = self.net(features, rnn_hidden_states)
        logits, value = self.heads(feats, **kw)
        return value, logits, rnn_hidden_states

    def get_value(self, features, rnn_hidden_states, **kw):
        feats, _ = self.net(features, rnn_hidden_states)
        _logits, value = self.heads(feats, **kw)
        return value


if __name__ == "__main__":
    F = 32          # net.output_size
    A = 4           # dim_actions
    H_RNN = 32      # rnn hidden size (passed through untouched)

    key = jax.random.PRNGKey(0)
    k_p, k1, k2, k3, k_r = jax.random.split(key, 5)
    policy = Policy(output_size=F, dim_actions=A, key=k_p)

    def ref_heads(x, p):
        return x @ p.wa.T + p.ba, x @ p.wc.T + p.bc

    # 1) Small batch, forced through the Pallas kernel (single 8-row tile).
    B = 8
    feats = jax.random.normal(k1, (B, F), jnp.float32)
    rnn = jax.random.normal(k_r, (1, B, H_RNN), jnp.float32)
    logits, rnn_out = policy.forward(feats, rnn, force_pallas=True)
    value, logits2, _ = policy.evaluate(feats, rnn, force_pallas=True)
    jax.block_until_ready((logits, logits2, value, rnn_out))
    rl, rv = ref_heads(feats, policy)
    assert logits.shape == (B, A) and value.shape == (B, 1)
    assert jnp.allclose(logits, rl, atol=1e-5, rtol=1e-5)
    assert jnp.allclose(logits2, rl, atol=1e-5, rtol=1e-5)
    assert jnp.allclose(value, rv, atol=1e-5, rtol=1e-5)
    assert jnp.array_equal(rnn_out, rnn)

    # 2) Tiny-batch auto path (plain jnp dot; Pallas overhead not worth it, B<128).
    B = 16
    feats = jax.random.normal(k2, (B, F), jnp.float32)
    logits, _ = policy.forward(feats, rnn[:, :B])
    value = policy.get_value(feats, rnn[:, :B])
    jax.block_until_ready((logits, value))
    rl, rv = ref_heads(feats, policy)
    assert jnp.allclose(logits, rl, atol=1e-5, rtol=1e-5)
    assert jnp.allclose(value, rv, atol=1e-5, rtol=1e-5)

    # 3) Larger batch: multi-block grid (512-row tiles) with a ragged last block.
    B = 1100
    feats = jax.random.normal(k3, (B, F), jnp.float32)
    value, logits, _ = policy.evaluate(feats, jnp.zeros((1, B, H_RNN), jnp.float32))
    jax.block_until_ready((logits, value))
    rl, rv = ref_heads(feats, policy)
    assert logits.shape == (B, A) and value.shape == (B, 1)
    assert jnp.allclose(logits, rl, atol=1e-5, rtol=1e-5)
    assert jnp.allclose(value, rv, atol=1e-5, rtol=1e-5)

    # 4) bf16-parameter variant (halves feature/weight read bytes on the MXU);
    #    accumulation + bias add remain f32, so only input rounding error remains.
    policy16 = Policy(output_size=F, dim_actions=A, key=k_p, param_dtype=jnp.bfloat16)
    v16, l16, _ = policy16.evaluate(feats.astype(jnp.bfloat16),
                                    jnp.zeros((1, B, H_RNN), jnp.float32))
    jax.block_until_ready((l16, v16))
    assert jnp.allclose(l16, rl, atol=1e-1, rtol=1e-1)
    assert jnp.allclose(v16, rv, atol=1e-1, rtol=1e-1)

    print("KERNEL_OK")
</pallas_src>

<mosaic_0001>
module attributes {stable_mosaic.version = 11 : i64} {
  func.func @_fused_heads_kernel(%arg0: i32, %arg1: memref<8x32xf32, #tpu.memory_space<vmem>>, %arg2: memref<32x5xf32, #tpu.memory_space<vmem>>, %arg3: memref<1x5xf32, #tpu.memory_space<vmem>>, %arg4: memref<8x4xf32, #tpu.memory_space<vmem>>, %arg5: memref<8x1xf32, #tpu.memory_space<vmem>>) attributes {dimension_semantics = [#tpu.dimension_semantics<parallel>], iteration_bounds = array<i64: 1>, scalar_prefetch = 0 : i64, scratch_operands = 0 : i64, tpu.core_type = #tpu.core_type<tc>, window_params = [{transform_indices = @transform_0, window_bounds = array<i64: 8, 32>}, {pipeline_mode = #tpu.pipeline_mode<synchronous>, transform_indices = @transform_1, window_bounds = array<i64: 32, 5>}, {pipeline_mode = #tpu.pipeline_mode<synchronous>, transform_indices = @transform_2, window_bounds = array<i64: 1, 5>}, {transform_indices = @transform_3, window_bounds = array<i64: 8, 4>}, {transform_indices = @transform_4, window_bounds = array<i64: 8, 1>}]} {
    %c0 = arith.constant 0 : index
    %c0_0 = arith.constant 0 : index
    %0 = vector.load %arg2[%c0, %c0_0] : memref<32x5xf32, #tpu.memory_space<vmem>>, vector<32x5xf32>
    %c0_1 = arith.constant 0 : index
    %c0_2 = arith.constant 0 : index
    %1 = vector.load %arg1[%c0_1, %c0_2] : memref<8x32xf32, #tpu.memory_space<vmem>>, vector<8x32xf32>
    %cst = arith.constant dense<0.000000e+00> : vector<8x5xf32>
    %2 = tpu.matmul %1, %0, %cst {dimension_numbers = #tpu.dot_dimension_numbers<[1], [0], [0], [1], [0, 0, 1, 1], [], []>} : vector<8x32xf32>, vector<32x5xf32>, vector<8x5xf32> -> vector<8x5xf32>
    %c0_3 = arith.constant 0 : index
    %c0_4 = arith.constant 0 : index
    %3 = vector.load %arg3[%c0_3, %c0_4] : memref<1x5xf32, #tpu.memory_space<vmem>>, vector<1x5xf32>
    %4 = vector.broadcast %3 : vector<1x5xf32> to vector<8x5xf32>
    %5 = arith.addf %2, %4 : vector<8x5xf32>
    %6 = vector.extract_strided_slice %5 {offsets = [0, 0], sizes = [8, 4], strides = [1, 1]} : vector<8x5xf32> to vector<8x4xf32>
    %c0_5 = arith.constant 0 : index
    %c0_6 = arith.constant 0 : index
    %7 = vector.load %arg4[%c0_5, %c0_6] : memref<8x4xf32, #tpu.memory_space<vmem>>, vector<8x4xf32>
    tpu.vector_store %arg4[%c0_5, %c0_6], %6 {strides = array<i32>} : memref<8x4xf32, #tpu.memory_space<vmem>>, vector<8x4xf32>,
    %8 = vector.extract_strided_slice %5 {offsets = [0, 4], sizes = [8, 1], strides = [1, 1]} : vector<8x5xf32> to vector<8x1xf32>
    %c0_7 = arith.constant 0 : index
    %c0_8 = arith.constant 0 : index
    %9 = vector.load %arg5[%c0_7, %c0_8] : memref<8x1xf32, #tpu.memory_space<vmem>>, vector<8x1xf32>
    tpu.vector_store %arg5[%c0_7, %c0_8], %8 {strides = array<i32>} : memref<8x1xf32, #tpu.memory_space<vmem>>, vector<8x1xf32>,
    return
  }
  func.func @transform_0(%arg0: i32) -> (i32, i32) {
    %c0_i32 = arith.constant 0 : i32
    %c0_i32_0 = arith.constant 0 : i32
    return %arg0, %c0_i32 : i32, i32
  }
  func.func @transform_1(%arg0: i32) -> (i32, i32) {
    %c0_i32 = arith.constant 0 : i32
    %c0_i32_0 = arith.constant 0 : i32
    %c0_i32_1 = arith.constant 0 : i32
    return %c0_i32, %c0_i32_0 : i32, i32
  }
  func.func @transform_2(%arg0: i32) -> (i32, i32) {
    %c0_i32 = arith.constant 0 : i32
    %c0_i32_0 = arith.constant 0 : i32
    %c0_i32_1 = arith.constant 0 : i32
    return %c0_i32, %c0_i32_0 : i32, i32
  }
  func.func @transform_3(%arg0: i32) -> (i32, i32) {
    %c0_i32 = arith.constant 0 : i32
    %c0_i32_0 = arith.constant 0 : i32
    return %arg0, %c0_i32 : i32, i32
  }
  func.func @transform_4(%arg0: i32) -> (i32, i32) {
    %c0_i32 = arith.constant 0 : i32
    %c0_i32_0 = arith.constant 0 : i32
    return %arg0, %c0_i32 : i32, i32
  }
}

</mosaic_0001>

<bundles_post_ra>
// kernel: tpu_custom_call.1
= control target key start
LH: loop header
LB: loop body
LE: loop exit
PB: predicated region body
PF: predicated region fallthrough
CT: control target
= control target key end

     0   :  { %v146_v0 = vmov 0.0|0.0   ;;  %vm147_vm0 = vmmov 0   ;;  %v148_v4 = vmov 0.0   ;;  %vm28_vm1 = vcmask 261120   ;;  %s149_s28 = smov 124   ;;  %s199_s1 = inlined_call_operand.vmem [shape: f32[32,5], index: 1, kind: input, shape index: {}]   ;;  %s200_s0 = inlined_call_operand.vmem [shape: f32[8,32], index: 0, kind: input, shape index: {}]   ;;  %s201_s2 = inlined_call_operand.vmem [shape: f32[1,5], index: 2, kind: input, shape index: {}]   ;;  %s202_s3 = inlined_call_operand.vmem [shape: f32[8,4], index: 3, kind: output, shape index: {0}]   ;;  %s203_s4 = inlined_call_operand.vmem [shape: f32[8,1], index: 4, kind: output, shape index: {1}]  }
   0x1   :  { %136 = vmatprep.subr.bf16.mxu0 %v146_v0  ;;  %v16_v1 = vld [vmem:[%s199_s1] sm:$0xff]  ;;  %v17_v2 = vld [vmem:[%s199_s1 + $0x8] sm:$0xff]  ;;  %v18_v3 = vld [vmem:[%s199_s1 + $0x10] sm:$0xff]  ;;  %133 = vmatprep.mubr.msk.f32.mxu0 %vm147_vm0, %v148_v4  ;;  %vm102_vm2 = vcmask 31744   ;;  %vm108_vm3 = vcmask 7168  }
   0x2   :  { %v137_v5 = vpack.c.bf16 %v17_v2, %v16_v1  ;;  %v19_v6 = vld [vmem:[%s199_s1 + $0x18] sm:$0xff]  ;;  %v20_v8 = vld [vmem:[%s200_s0] sm:$0xff] }
   0x3   :  { %v140_v7 = vpack.c.bf16 %v19_v6, %v18_v3  ;;  %v118_v9 = vld [vmem:[%s201_s2] ss:$0 sm:$0xff] }
   0x4   :  { %138 = vmatpush3.bf16.msra.mxu0 %v137_v5 }
   0x5   :  { %139 = vmatprep.subr.bf16.mxu0 %v146_v0 }
   0x8   :  { %141 = vmatpush3.bf16.msra.mxu0 %v140_v7 }
   0xb   :  { %134 = vmatmul.mubr.msk.f32.vlgmr.msra.gmra.mrb[0].mxu0 %vm28_vm1, %v20_v8 }
  0xde   :  { %v98_v10 = vpop.f32.mrb[0].mxu0 }
  0xdf   :  { %v99_v11 = vadd.f32 %v118_v9, %v98_v10  ;;  %v135_v12 = vpop.f32.mrb[1].mxu0 }
  0xe1   :  { %103 = vst.msk [vmem:[%s202_s3] sm:$0xff] %vm102_vm2, %v99_v11  ;;  %105 = vrot.lane.b32.xlu0 %v99_v11, %s149_s28 }
 0x153   :  { %v106_v13 = vpop.permute.xlu0 %105 }
 0x154   :  { %109 = vst.msk [vmem:[%s203_s4] sm:$0xff] %vm108_vm3, %v106_v13 }

</bundles_post_ra>
